<compile_context>
chip_gen: v5e
topology: v5e:2x2
jax: 0.10.0
libtpu: 0.0.40
codegen_flags: <defaults>
</compile_context>

<pallas_src>
import jax
import jax.numpy as jnp
from jax.experimental import pallas as pl
from jax.experimental.pallas import tpu as pltpu

LANE = 128
SUBLANE = 8


def _round_up(x, m):
    return ((x + m - 1) // m) * m


def _cdiv(a, b):
    return (a + b - 1) // b


def actor_kernel(x_ref, w1_ref, b1_ref, w2_ref, b2_ref, o_ref):
    # fc_1: bf16 operands feed the MXU, accumulate in f32. Bias stays f32.
    h = jnp.dot(x_ref[...], w1_ref[...], preferred_element_type=jnp.float32) + b1_ref[...]
    # LeakyReLU(negative_slope=0.05): mul + max instead of compare + select.
    h = jnp.maximum(h, 0.05 * h)
    # fc_2 into the lane-padded (128-wide) logit slab; padded lanes carry a -1e30 bias.
    logits = jnp.dot(
        h.astype(jnp.bfloat16), w2_ref[...], preferred_element_type=jnp.float32
    ) + b2_ref[...]
    # Softmax over the feature (lane) axis. Padded lanes: exp(-1e30 - m) underflows to 0.
    m = jnp.max(logits, axis=1, keepdims=True)
    e = jnp.exp(logits - m)
    denom = jnp.sum(e, axis=1, keepdims=True)
    # Exact normalization (approx reciprocal left rows summing to 1 only within ~1e-3).
    o_ref[...] = (e / denom).astype(o_ref.dtype)


def prepare_actor_params(w1, b1, w2, b2):
    """One-time preprocessing: lane-pad hidden/output dims and cast MXU operands to bf16."""
    in_dim, hidd = w1.shape
    out_dim = w2.shape[1]
    hidd_pad = _round_up(hidd, LANE)
    out_pad = _round_up(out_dim, LANE)

    # Zero-pad hidden: LeakyReLU(0 + 0) = 0 and zero w2 rows contribute 0 -> exact.
    w1p = jnp.pad(w1, ((0, 0), (0, hidd_pad - hidd))).astype(jnp.bfloat16)
    b1p = jnp.pad(b1, ((0, 0), (0, hidd_pad - hidd))).astype(jnp.float32)
    # Pad fc2 output columns; padded logits get a huge negative f32 bias -> softmax ~0 there.
    w2p = jnp.pad(w2, ((0, hidd_pad - hidd), (0, out_pad - out_dim))).astype(jnp.bfloat16)
    b2p = jnp.pad(
        b2.astype(jnp.float32), ((0, 0), (0, out_pad - out_dim)), constant_values=-1e30
    )
    return w1p, b1p, w2p, b2p, out_dim


def actor_forward(x, w1p, b1p, w2p, b2p, out_dim, *, max_batch_tile=256):
    B, in_dim = x.shape
    hidd_pad = w1p.shape[1]
    out_pad = w2p.shape[1]

    # Balanced batch tiling: minimize over-padding, and keep grid >= 2 when B allows it
    # so the "parallel" batch axis shards across both TensorCores on v7x.
    b_rounded = _round_up(max(B, SUBLANE), SUBLANE)
    n_tiles = _cdiv(b_rounded, max_batch_tile)
    if b_rounded >= 2 * SUBLANE:
        n_tiles = max(n_tiles, 2)
    TB = _round_up(_cdiv(b_rounded, n_tiles), SUBLANE)
    b_padded = _round_up(b_rounded, TB)

    # Pre-cast the streamed activations to bf16 (halves x DMA bytes); pad batch if needed.
    xb = x.astype(jnp.bfloat16)
    if b_padded != B:
        xb = jnp.pad(xb, ((0, b_padded - B), (0, 0)))

    grid = (b_padded // TB,)

    out_padded = pl.pallas_call(
        actor_kernel,
        out_shape=jax.ShapeDtypeStruct((b_padded, out_pad), jnp.float32),
        grid_spec=pltpu.PrefetchScalarGridSpec(
            num_scalar_prefetch=0,
            grid=grid,
            in_specs=[
                pl.BlockSpec((TB, in_dim), lambda i: (i, 0)),        # streamed batch tile (bf16)
                pl.BlockSpec((in_dim, hidd_pad), lambda i: (0, 0)),  # resident fc1 weights (bf16)
                pl.BlockSpec((1, hidd_pad), lambda i: (0, 0)),       # resident fc1 bias (f32)
                pl.BlockSpec((hidd_pad, out_pad), lambda i: (0, 0)), # resident fc2 weights (bf16)
                pl.BlockSpec((1, out_pad), lambda i: (0, 0)),        # resident fc2 bias (f32)
            ],
            out_specs=pl.BlockSpec((TB, out_pad), lambda i: (i, 0)),
        ),
        compiler_params=pltpu.CompilerParams(
            dimension_semantics=("parallel",),
            vmem_limit_bytes=32 * 1024 * 1024,
        ),
    )(xb, w1p, b1p, w2p, b2p)

    # TODO(synk): if the consumer tolerates a lane-padded slab, return out_padded directly
    # and skip this eager slice (saves one HBM round trip).
    return out_padded[:B, :out_dim]


def init_params(key, in_dim, hidd_dim, out_dim):
    # Deterministic synthetic init mimicking nn.Linear's uniform(-1/sqrt(fan_in), 1/sqrt(fan_in)).
    k1, k2, k3, k4 = jax.random.split(key, 4)
    s1 = 1.0 / jnp.sqrt(in_dim)
    s2 = 1.0 / jnp.sqrt(hidd_dim)
    w1 = jax.random.uniform(k1, (in_dim, hidd_dim), jnp.float32, -s1, s1)
    b1 = jax.random.uniform(k2, (1, hidd_dim), jnp.float32, -s1, s1)
    w2 = jax.random.uniform(k3, (hidd_dim, out_dim), jnp.float32, -s2, s2)
    b2 = jax.random.uniform(k4, (1, out_dim), jnp.float32, -s2, s2)
    return w1, b1, w2, b2


if __name__ == "__main__":
    key = jax.random.PRNGKey(0)
    B, in_dim, hidd_dim, out_dim = 8, 16, 32, 8
    kx, kp = jax.random.split(key)
    x = jax.random.normal(kx, (B, in_dim), jnp.float32)
    w1, b1, w2, b2 = init_params(kp, in_dim, hidd_dim, out_dim)

    # One-time weight preprocessing (pad + bf16 cast); not paid per forward call.
    w1p, b1p, w2p, b2p, out_dim_real = prepare_actor_params(w1, b1, w2, b2)

    out = actor_forward(x, w1p, b1p, w2p, b2p, out_dim_real)
    out = jax.block_until_ready(out)

    # Reference check in plain f32 JAX (kernel uses bf16 MXU inputs, so tolerance is loosened).
    h_ref = x @ w1 + b1
    h_ref = jnp.where(h_ref >= 0, h_ref, 0.05 * h_ref)
    logits_ref = h_ref @ w2 + b2
    ref = jax.nn.softmax(logits_ref, axis=1)

    assert out.shape == (B, out_dim)
    assert jnp.allclose(out, ref, atol=1e-2, rtol=1e-2)
    assert jnp.allclose(jnp.sum(out, axis=1), 1.0, atol=2e-3)

    print("KERNEL_OK")
</pallas_src>

<mosaic_0001>
module attributes {stable_mosaic.version = 11 : i64} {
  func.func @actor_kernel(%arg0: i32, %arg1: memref<8x16xbf16, #tpu.memory_space<vmem>>, %arg2: memref<16x128xbf16, #tpu.memory_space<vmem>>, %arg3: memref<1x128xf32, #tpu.memory_space<vmem>>, %arg4: memref<128x128xbf16, #tpu.memory_space<vmem>>, %arg5: memref<1x128xf32, #tpu.memory_space<vmem>>, %arg6: memref<8x128xf32, #tpu.memory_space<vmem>>) attributes {dimension_semantics = [#tpu.dimension_semantics<parallel>], iteration_bounds = array<i64: 1>, scalar_prefetch = 0 : i64, scratch_operands = 0 : i64, tpu.core_type = #tpu.core_type<tc>, window_params = [{transform_indices = @transform_0, window_bounds = array<i64: 8, 16>}, {pipeline_mode = #tpu.pipeline_mode<synchronous>, transform_indices = @transform_1, window_bounds = array<i64: 16, 128>}, {pipeline_mode = #tpu.pipeline_mode<synchronous>, transform_indices = @transform_2, window_bounds = array<i64: 1, 128>}, {pipeline_mode = #tpu.pipeline_mode<synchronous>, transform_indices = @transform_3, window_bounds = array<i64: 128, 128>}, {pipeline_mode = #tpu.pipeline_mode<synchronous>, transform_indices = @transform_4, window_bounds = array<i64: 1, 128>}, {transform_indices = @transform_5, window_bounds = array<i64: 8, 128>}]} {
    %c0 = arith.constant 0 : index
    %c0_0 = arith.constant 0 : index
    %0 = vector.load %arg1[%c0, %c0_0] : memref<8x16xbf16, #tpu.memory_space<vmem>>, vector<8x16xbf16>
    %c0_1 = arith.constant 0 : index
    %c0_2 = arith.constant 0 : index
    %1 = vector.load %arg2[%c0_1, %c0_2] : memref<16x128xbf16, #tpu.memory_space<vmem>>, vector<16x128xbf16>
    %cst = arith.constant dense<0.000000e+00> : vector<8x128xf32>
    %2 = tpu.matmul %0, %1, %cst {dimension_numbers = #tpu.dot_dimension_numbers<[1], [0], [0], [1], [0, 0, 1, 1], [], []>} : vector<8x16xbf16>, vector<16x128xbf16>, vector<8x128xf32> -> vector<8x128xf32>
    %c0_3 = arith.constant 0 : index
    %c0_4 = arith.constant 0 : index
    %3 = vector.load %arg3[%c0_3, %c0_4] : memref<1x128xf32, #tpu.memory_space<vmem>>, vector<1x128xf32>
    %4 = vector.broadcast %3 : vector<1x128xf32> to vector<8x128xf32>
    %5 = arith.addf %2, %4 : vector<8x128xf32>
    %cst_5 = arith.constant 5.000000e-02 : f32
    %6 = vector.broadcast %cst_5 : f32 to vector<8x128xf32>
    %7 = arith.mulf %6, %5 : vector<8x128xf32>
    %8 = arith.maximumf %5, %7 : vector<8x128xf32>
    %9 = arith.truncf %8 : vector<8x128xf32> to vector<8x128xbf16>
    %c0_6 = arith.constant 0 : index
    %c0_7 = arith.constant 0 : index
    %10 = vector.load %arg4[%c0_6, %c0_7] : memref<128x128xbf16, #tpu.memory_space<vmem>>, vector<128x128xbf16>
    %cst_8 = arith.constant dense<0.000000e+00> : vector<8x128xf32>
    %11 = tpu.matmul %9, %10, %cst_8 {dimension_numbers = #tpu.dot_dimension_numbers<[1], [0], [0], [1], [0, 0, 1, 1], [], []>} : vector<8x128xbf16>, vector<128x128xbf16>, vector<8x128xf32> -> vector<8x128xf32>
    %c0_9 = arith.constant 0 : index
    %c0_10 = arith.constant 0 : index
    %12 = vector.load %arg5[%c0_9, %c0_10] : memref<1x128xf32, #tpu.memory_space<vmem>>, vector<1x128xf32>
    %13 = vector.broadcast %12 : vector<1x128xf32> to vector<8x128xf32>
    %14 = arith.addf %11, %13 : vector<8x128xf32>
    %cst_11 = arith.constant dense<0xFF800000> : vector<8xf32>
    %15 = vector.multi_reduction <maximumf>, %14, %cst_11 [1] : vector<8x128xf32> to vector<8xf32>
    %16 = vector.shape_cast %15 : vector<8xf32> to vector<8x1xf32>
    %17 = vector.broadcast %16 : vector<8x1xf32> to vector<8x128xf32>
    %18 = arith.subf %14, %17 : vector<8x128xf32>
    %19 = math.exp %18 : vector<8x128xf32>
    %cst_12 = arith.constant dense<0.000000e+00> : vector<8xf32>
    %20 = vector.multi_reduction <add>, %19, %cst_12 [1] : vector<8x128xf32> to vector<8xf32>
    %21 = vector.shape_cast %20 : vector<8xf32> to vector<8x1xf32>
    %22 = vector.broadcast %21 : vector<8x1xf32> to vector<8x128xf32>
    %23 = arith.divf %19, %22 : vector<8x128xf32>
    %c0_13 = arith.constant 0 : index
    %c0_14 = arith.constant 0 : index
    %24 = vector.load %arg6[%c0_13, %c0_14] : memref<8x128xf32, #tpu.memory_space<vmem>>, vector<8x128xf32>
    tpu.vector_store %arg6[%c0_13, %c0_14], %23 {strides = array<i32>} : memref<8x128xf32, #tpu.memory_space<vmem>>, vector<8x128xf32>,
    return
  }
  func.func @transform_0(%arg0: i32) -> (i32, i32) {
    %c0_i32 = arith.constant 0 : i32
    %c0_i32_0 = arith.constant 0 : i32
    return %arg0, %c0_i32 : i32, i32
  }
  func.func @transform_1(%arg0: i32) -> (i32, i32) {
    %c0_i32 = arith.constant 0 : i32
    %c0_i32_0 = arith.constant 0 : i32
    %c0_i32_1 = arith.constant 0 : i32
    return %c0_i32, %c0_i32_0 : i32, i32
  }
  func.func @transform_2(%arg0: i32) -> (i32, i32) {
    %c0_i32 = arith.constant 0 : i32
    %c0_i32_0 = arith.constant 0 : i32
    %c0_i32_1 = arith.constant 0 : i32
    return %c0_i32, %c0_i32_0 : i32, i32
  }
  func.func @transform_3(%arg0: i32) -> (i32, i32) {
    %c0_i32 = arith.constant 0 : i32
    %c0_i32_0 = arith.constant 0 : i32
    %c0_i32_1 = arith.constant 0 : i32
    return %c0_i32, %c0_i32_0 : i32, i32
  }
  func.func @transform_4(%arg0: i32) -> (i32, i32) {
    %c0_i32 = arith.constant 0 : i32
    %c0_i32_0 = arith.constant 0 : i32
    %c0_i32_1 = arith.constant 0 : i32
    return %c0_i32, %c0_i32_0 : i32, i32
  }
  func.func @transform_5(%arg0: i32) -> (i32, i32) {
    %c0_i32 = arith.constant 0 : i32
    %c0_i32_0 = arith.constant 0 : i32
    return %arg0, %c0_i32 : i32, i32
  }
}

</mosaic_0001>

<bundles_post_ra>
// kernel: tpu_custom_call.1
= control target key start
LH: loop header
LB: loop body
LE: loop exit
PB: predicated region body
PF: predicated region fallthrough
CT: control target
= control target key end

     0   :  { %10 = vsyncpa [#allocation3], 0  ;;  %s436_s0 = inlined_call_operand.hbm [shape: bf16[8,16], index: 0, kind: input, shape index: {}]   ;;  %s437_s1 = inlined_call_operand.hbm [shape: bf16[16,128], index: 1, kind: input, shape index: {}]   ;;  %s438_s2 = inlined_call_operand.vmem [shape: f32[1,128], index: 2, kind: input, shape index: {}]   ;;  %s439_s3 = inlined_call_operand.hbm [shape: bf16[128,128], index: 3, kind: input, shape index: {}]   ;;  %s440_s4 = inlined_call_operand.vmem [shape: f32[1,128], index: 4, kind: input, shape index: {}]   ;;  %s441_s5 = inlined_call_operand.hbm [shape: f32[8,128], index: 5, kind: output, shape index: {}]  }
   0x1   :  { %11 = vsyncpa [#allocation6], 0  ;;  %s28_s20 = sshll.u32 %s437_s1, 4  ;;  %s29_s20 = int_to_ptr.hbm [resolvable:$true] %s28_s20 }
   0x2   :  { %12 = vsyncpa [#allocation4], 0  ;;  %s382_s21 = smov [#allocation5]   ;;  %s18_s25 = sshll.u32 %s436_s0, 4  ;;  %s19_s25 = int_to_ptr.hbm [resolvable:$true] %s18_s25 }
   0x3   :  { %s30_s22 = sshll.u32 %s382_s21, 4  ;;  %s383_s26 = smov 64   ;;  %s31_s22 = int_to_ptr.vmem [resolvable:$true] %s30_s22 }
   0x4   :  { %s384_s27 = smov 4   ;;  %s385_s28 = smov [#allocation2]  }
   0x5   :  { %36 = dma.hbm_to_vmem [thread:$0]  %s29_s20, 128, %s31_s22, [#allocation6], %s383_s26, %s383_s26, %s384_s27  }
   0x6   :  { %s20_s29 = sshll.u32 %s385_s28, 4  ;;  %s43_s7 = sshll.u32 %s439_s3, 4  ;;  %s21_s29 = int_to_ptr.vmem [resolvable:$true] %s20_s29  ;;  %s44_s7 = int_to_ptr.hbm [resolvable:$true] %s43_s7 }
   0x7   :  { %23 = dma.hbm_to_vmem [thread:$0]  %s19_s25, 64, %s21_s29, [#allocation3]  }
   0x8   :  { %s386_s1 = smov [#allocation7]  }
   0x9   :  { %s45_s8 = sshll.u32 %s386_s1, 4  ;;  %s46_s8 = int_to_ptr.vmem [resolvable:$true] %s45_s8 }
   0xa   :  { %51 = dma.hbm_to_vmem [thread:$0]  %s44_s7, 1024, %s46_s8, [#allocation6], %s383_s26, %s383_s26, %s384_s27  }
   0xb   :  { %376 = dma.done.wait [#allocation3], 64  }
   0xc   :  { %377 = vsyncadd [#allocation3], 4294967232 }
   0xd   :  { %378 = dma.done.wait [#allocation6], 1152  }
   0xe   :  { %379 = vsyncadd [#allocation6], 4294966144  ;;  %v259_v0 = vld [vmem:[#allocation5] sm:$0xff]  ;;  %v67_v2 = vld [vmem:[#allocation2] sm:$0xf]  ;;  %vm80_vm0 = vcmask 130048  }
   0xf   :  { %v267_v1 = vld [vmem:[#allocation7 + $0x38] sm:$0xff]  ;;  %91 = vmatpush.bf16.msra.mxu0 %v259_v0  ;;  %v266_v3 = vld [vmem:[#allocation7 + $0x30] sm:$0xff]  ;;  %v265_v4 = vld [vmem:[#allocation7 + $0x28] sm:$0xff]  ;;  %s211_s13 = sshll.u32 %s441_s5, 4  ;;  %s212_s13 = int_to_ptr.hbm [resolvable:$true] %s211_s13 }
  0x10   :  { %168 = vmatpush.bf16.msra.mxu1 %v267_v1  ;;  %v264_v5 = vld [vmem:[#allocation7 + $0x20] sm:$0xff]  ;;  %v263_v6 = vld [vmem:[#allocation7 + $0x18] sm:$0xff]  ;;  %v262_v7 = vld [vmem:[#allocation7 + $0x10] sm:$0xff] }
  0x11   :  { %v261_v8 = vld [vmem:[#allocation7 + $0x8] sm:$0xff]  ;;  %v260_v9 = vld [vmem:[#allocation7] sm:$0xff]  ;;  %v274_v10 = vld [vmem:[%s438_s2] ss:$0 sm:$0xff]  ;;  %s387_s2 = smov [#allocation8]  }
  0x12   :  { %226 = vmatmul.msk.bf16.vlgmr.msra.gmra.mxu0 %vm80_vm0, %v67_v2  ;;  %v275_v17 = vld [vmem:[%s440_s4] ss:$0 sm:$0xff]  ;;  %s209_s4 = sshll.u32 %s387_s2, 4  ;;  %s210_s4 = int_to_ptr.vmem [resolvable:$true] %s209_s4 }
  0x14   :  { %169 = vmatpush.bf16.msra.mxu1 %v266_v3 }
  0x18   :  { %170 = vmatpush.bf16.msra.mxu1 %v265_v4 }
  0x1c   :  { %171 = vmatpush.bf16.msra.mxu1 %v264_v5 }
  0x20   :  { %172 = vmatpush.bf16.msra.mxu1 %v263_v6 }
  0x24   :  { %173 = vmatpush.bf16.msra.mxu1 %v262_v7 }
  0x28   :  { %174 = vmatpush.bf16.msra.mxu1 %v261_v8 }
  0x2c   :  { %175 = vmatpush.bf16.msra.mxu1 %v260_v9 }
  0x8f   :  { %v93_v11 = vpop.f32.mrf.mxu0 }
  0x90   :  { %v94_v12 = vadd.f32 %v274_v10, %v93_v11 }
  0x92   :  { %v97_v13 = vmul.f32 0.05, %v94_v12 }
  0x94   :  { %v98_v14 = vmax.f32 %v94_v12, %v97_v13 }
  0x96   :  { %v99_v15 = vpack.c.bf16 %v98_v14, %v98_v14 }
  0x97   :  { %v95_v16 = vpop.f32.mrf.mxu0 }
  0x98   :  { %176 = vmatmul.bf16.vlgmr.msra.gmra.mxu1 %v99_v15 }
 0x115   :  { %v177_v18 = vpop.f32.mrf.mxu1 }
 0x116   :  { %v178_v19 = vadd.f32 %v275_v17, %v177_v18 }
 0x118   :  { %181 = vmax.xlane.f32.xlu0 %v178_v19 }
 0x11d   :  { %v179_v20 = vpop.f32.mrf.mxu1 }
 0x18b   :  { %v182_v21 = vpop.xlane.xlu0 %181 }
 0x18c   :  { %v183_v22 = vsub.f32 %v178_v19, %v182_v21 }
 0x18e   :  { %v184_v23 = vmul.f32 1.442695, %v183_v22 }
 0x190   :  { %276 = vpow2.f32 %v184_v23 }
 0x196   :  { %v277_v24 = vpop.eup %276 }
 0x197   :  { %186 = vadd.xlane.f32.xlu0 %v277_v24 }
 0x20a   :  { %v187_v25 = vpop.xlane.xlu0 %186 }
 0x20b   :  { %278 = vrcp.f32 %v187_v25  ;;  %v199_v29 = vand.u32 2147483648, %v187_v25  ;;  %v197_v31 = vand.u32 2147483647, %v187_v25  ;;  %vm193_vm2 = vweird.f32 %v187_v25 }
 0x20d   :  { %v200_v33 = vor.u32 1.1754944e-38, %v199_v29  ;;  %vm198_vm4 = vcmp.eq.f32.partialorder %v197_v31, 8.507059e+37 }
 0x211   :  { %v279_v26 = vpop.eup %278 }
 0x212   :  { %v189_v27 = vmul.f32 %v279_v26, %v187_v25  ;;  %vm194_vm1 = vweird.f32 %v279_v26 }
 0x213   :  { %vm195_vm3 = vmor %vm193_vm2, %vm194_vm1 }
 0x214   :  { %v190_v28 = vsub.f32 1.0, %v189_v27 }
 0x216   :  { %v191_v30 = vmul.f32 %v279_v26, %v190_v28 }
 0x218   :  { %v192_v32 = vadd.f32 %v279_v26, %v191_v30 }
 0x21a   :  { %v196_v34 = vsel %vm195_vm3, %v279_v26, %v192_v32 }
 0x21b   :  { %v201_v35 = vsel %vm198_vm4, %v200_v33, %v196_v34 }
 0x21c   :  { %v202_v36 = vmul.f32 %v277_v24, %v201_v35 }
 0x21e   :  { %203 = vst [vmem:[#allocation8] sm:$0xff] %v202_v36 }
 0x21f   :  { %214 = dma.vmem_to_hbm [thread:$0]  %s210_s4, 128, %s212_s13, [#allocation4]  }
 0x220   :  { %380 = dma.done.wait [#allocation4], 128  }
 0x221   :  { %381 = vsyncadd [#allocation4], 4294967168 }
 0x222   :  { %219 = vsyncpa [#allocation3], 1 }
 0x223   :  { %220 = vsyncpa [#allocation6], 1 }
 0x224   :  { %221 = vsyncpa [#allocation4], 1 }

</bundles_post_ra>
